<compile_context>
chip_gen: v7x
topology: tpu7x:2x2x1
jax: 0.10.0
libtpu: 0.0.40
codegen_flags: <defaults>
</compile_context>

<pallas_src>
import numpy as np
import jax
import jax.numpy as jnp
from jax.experimental import pallas as pl
from jax.experimental.pallas import tpu as pltpu

EPS = 1e-4
TWO_PI = 2.0 * np.pi


def _round_up(a, b):
    return ((a + b - 1) // b) * b


def gaussian2d_kernel(coords_ref, params_ref, o_ref):
    # coords_ref: VMEM (2, HW)        rows = [x, y] flattened meshgrid coords
    # params_ref: VMEM (block_n, 6)   cols = [amp, x0, y0, sigmax, sigmay, p]
    # o_ref:      VMEM (block_n, HW)  output block (units on sublanes)
    prm = params_ref[...]                         # (TN, 6)
    amp = prm[:, 0:1]                             # (TN, 1)
    x0 = prm[:, 1:2]
    y0 = prm[:, 2:3]
    sx = jnp.maximum(prm[:, 3:4], EPS)            # clamp(sigma, min=eps)
    sy = jnp.maximum(prm[:, 4:5], EPS)
    p = jnp.clip(prm[:, 5:6], -0.99, 0.99)        # clamp(p, -0.99, 0.99)

    # Per-unit quadratic coefficients (Horner / A-B-C form), computed once per
    # block on narrow (TN, 1) columns -> exact divides / sqrt are cheap here
    # and keep the numerics tight.
    inv_sx = 1.0 / sx
    inv_sy = 1.0 / sy
    one_m_p2 = 1.0 - p * p
    c = -0.5 / one_m_p2                           # -1 / (2 (1 - p^2))
    A = c * inv_sx * inv_sx
    B = -2.0 * p * c * inv_sx * inv_sy
    C = c * inv_sy * inv_sy
    a_coef = amp * inv_sx * inv_sy / (TWO_PI * jnp.sqrt(one_m_p2))

    xc = coords_ref[0:1, :]                       # (1, HW)
    yc = coords_ref[1:2, :]                       # (1, HW)

    # Per-element work: broadcasts of (TN,1)/(1,HW) + ~10 VPU ops + one EUP exp.
    dx = xc - x0                                  # (TN, HW)
    dy = yc - y0
    expo = dx * (A * dx + B * dy) + (C * dy) * dy
    o_ref[...] = a_coef * jnp.exp(expo)


def gaussian2d_forward(params, rf_size_y, rf_size_x, *, block_n=1024):
    """params: (6, N) f32 rows = [amp, x0, y0, sigmax, sigmay, p] -> (N, H, W)."""
    n = params.shape[1]
    hw = rf_size_y * rf_size_x

    # Pick the unit-block size: as large as requested, but never larger than
    # the (sublane-aligned) unit count; must be a multiple of 8 (sublanes).
    block_n = min(block_n, _round_up(n, 8))
    block_n = max(8, _round_up(block_n, 8))
    n_pad = _round_up(n, block_n)

    # Params transposed to (N, 6) so each unit's scalars sit on one sublane.
    # Padded units get benign values (amp=0, sigma=1, p=0): zero output, no NaN.
    params_t = params.T.astype(jnp.float32)       # (n, 6), tiny
    if n_pad != n:
        pad_row = jnp.array([[0.0, 0.0, 0.0, 1.0, 1.0, 0.0]], jnp.float32)
        params_t = jnp.concatenate(
            [params_t, jnp.tile(pad_row, (n_pad - n, 1))], axis=0)

    # Flattened meshgrid coordinates, same as torch.meshgrid(..., indexing='ij').
    ygrid, xgrid = jnp.meshgrid(
        jnp.arange(rf_size_y, dtype=jnp.float32),
        jnp.arange(rf_size_x, dtype=jnp.float32),
        indexing="ij",
    )
    coords = jnp.stack([xgrid.reshape(-1), ygrid.reshape(-1)], axis=0)  # (2, HW)

    cost = pl.CostEstimate(
        flops=10 * hw * n_pad,
        transcendentals=hw * n_pad,
        bytes_accessed=4 * hw * n_pad + 4 * 6 * n_pad + 4 * 2 * hw,
    )

    out = pl.pallas_call(
        gaussian2d_kernel,
        out_shape=jax.ShapeDtypeStruct((n_pad, hw), jnp.float32),
        grid=(n_pad // block_n,),
        in_specs=[
            # Coordinate block index is constant -> fetched once, reused.
            pl.BlockSpec((2, hw), lambda j: (0, 0)),
            pl.BlockSpec((block_n, 6), lambda j: (j, 0)),
        ],
        out_specs=pl.BlockSpec((block_n, hw), lambda j: (j, 0)),
        compiler_params=pltpu.CompilerParams(
            dimension_semantics=("parallel",),
            vmem_limit_bytes=32 * 1024 * 1024,
        ),
        cost_estimate=cost,
    )(coords, params_t)

    if n_pad != n:
        out = out[:n]
    # (N, HW) -> (N, H, W) is a pure reshape (no transpose, no extra HBM pass).
    return out.reshape(n, rf_size_y, rf_size_x)


def reference_forward(params, xgrid, ygrid):
    """Pure-JAX reference mirroring the PyTorch forward."""
    amp, x0, y0, sx, sy, p = [params[k] for k in range(6)]
    sx = jnp.maximum(sx, EPS)
    sy = jnp.maximum(sy, EPS)
    p = jnp.clip(p, -0.99, 0.99)
    amp = amp[:, None, None]
    x0 = x0[:, None, None]
    y0 = y0[:, None, None]
    sx = sx[:, None, None]
    sy = sy[:, None, None]
    p = p[:, None, None]
    dx = xgrid[None] - x0
    dy = ygrid[None] - y0
    g = (1.0 / (TWO_PI * sx * sy * jnp.sqrt(1.0 - p ** 2))) * jnp.exp(
        -(1.0 / (2.0 * (1.0 - p ** 2)))
        * ((dx / sx) ** 2 - 2.0 * p * (dx / sx) * (dy / sy) + (dy / sy) ** 2)
    )
    return amp * g


if __name__ == "__main__":
    rf_size = 20
    n_units = 8

    # Deterministic parameter init (the module's __init__ takes init vectors of
    # length n_units for each parameter).
    key = jax.random.PRNGKey(0)
    k_amp, k_x0, k_y0, k_sx, k_sy, k_p = jax.random.split(key, 6)
    amp_init = jax.random.uniform(k_amp, (n_units,), jnp.float32, 0.5, 2.0)
    x0_init = jax.random.uniform(k_x0, (n_units,), jnp.float32, 4.0, 16.0)
    y0_init = jax.random.uniform(k_y0, (n_units,), jnp.float32, 4.0, 16.0)
    sigmax_init = jax.random.uniform(k_sx, (n_units,), jnp.float32, 1.0, 4.0)
    sigmay_init = jax.random.uniform(k_sy, (n_units,), jnp.float32, 1.0, 4.0)
    p_init = jax.random.uniform(k_p, (n_units,), jnp.float32, -0.5, 0.5)

    params = jnp.stack(
        [amp_init, x0_init, y0_init, sigmax_init, sigmay_init, p_init], axis=0
    )  # (6, N)

    out = gaussian2d_forward(params, rf_size, rf_size)
    out = jax.block_until_ready(out)

    # Reference grids, same as torch.meshgrid(arange, arange, indexing='ij').
    ygrid, xgrid = jnp.meshgrid(
        jnp.arange(rf_size, dtype=jnp.float32),
        jnp.arange(rf_size, dtype=jnp.float32),
        indexing="ij",
    )
    ref = reference_forward(params, xgrid, ygrid)
    np.testing.assert_allclose(np.asarray(out), np.asarray(ref),
                               rtol=1e-4, atol=1e-6)

    print("KERNEL_OK")
</pallas_src>

<mosaic_0001>
module attributes {stable_mosaic.version = 11 : i64} {
  func.func @gaussian2d_kernel(%arg0: i32, %arg1: memref<2x400xf32, #tpu.memory_space<vmem>>, %arg2: memref<8x6xf32, #tpu.memory_space<vmem>>, %arg3: memref<8x400xf32, #tpu.memory_space<vmem>>) attributes {dimension_semantics = [#tpu.dimension_semantics<parallel>], iteration_bounds = array<i64: 1>, scalar_prefetch = 0 : i64, scratch_operands = 0 : i64, tpu.core_type = #tpu.core_type<tc>, window_params = [{pipeline_mode = #tpu.pipeline_mode<synchronous>, transform_indices = @transform_0, window_bounds = array<i64: 2, 400>}, {transform_indices = @transform_1, window_bounds = array<i64: 8, 6>}, {transform_indices = @transform_2, window_bounds = array<i64: 8, 400>}]} {
    %c0 = arith.constant 0 : index
    %c0_0 = arith.constant 0 : index
    %0 = vector.load %arg2[%c0, %c0_0] : memref<8x6xf32, #tpu.memory_space<vmem>>, vector<8x6xf32>
    %1 = vector.extract_strided_slice %0 {offsets = [0, 0], sizes = [8, 1], strides = [1, 1]} : vector<8x6xf32> to vector<8x1xf32>
    %2 = vector.extract_strided_slice %0 {offsets = [0, 1], sizes = [8, 1], strides = [1, 1]} : vector<8x6xf32> to vector<8x1xf32>
    %3 = vector.extract_strided_slice %0 {offsets = [0, 2], sizes = [8, 1], strides = [1, 1]} : vector<8x6xf32> to vector<8x1xf32>
    %4 = vector.extract_strided_slice %0 {offsets = [0, 3], sizes = [8, 1], strides = [1, 1]} : vector<8x6xf32> to vector<8x1xf32>
    %cst = arith.constant 9.99999974E-5 : f32
    %5 = vector.broadcast %cst : f32 to vector<8x1xf32>
    %6 = arith.maximumf %4, %5 : vector<8x1xf32>
    %7 = vector.extract_strided_slice %0 {offsets = [0, 4], sizes = [8, 1], strides = [1, 1]} : vector<8x6xf32> to vector<8x1xf32>
    %cst_1 = arith.constant 9.99999974E-5 : f32
    %8 = vector.broadcast %cst_1 : f32 to vector<8x1xf32>
    %9 = arith.maximumf %7, %8 : vector<8x1xf32>
    %10 = vector.extract_strided_slice %0 {offsets = [0, 5], sizes = [8, 1], strides = [1, 1]} : vector<8x6xf32> to vector<8x1xf32>
    %cst_2 = arith.constant -9.900000e-01 : f32
    %cst_3 = arith.constant 9.900000e-01 : f32
    %11 = vector.broadcast %cst_2 : f32 to vector<8x1xf32>
    %12 = arith.maximumf %11, %10 : vector<8x1xf32>
    %13 = vector.broadcast %cst_3 : f32 to vector<8x1xf32>
    %14 = arith.minimumf %13, %12 : vector<8x1xf32>
    %cst_4 = arith.constant 1.000000e+00 : f32
    %15 = vector.broadcast %cst_4 : f32 to vector<8x1xf32>
    %16 = arith.divf %15, %6 : vector<8x1xf32>
    %cst_5 = arith.constant 1.000000e+00 : f32
    %17 = vector.broadcast %cst_5 : f32 to vector<8x1xf32>
    %18 = arith.divf %17, %9 : vector<8x1xf32>
    %19 = arith.mulf %14, %14 : vector<8x1xf32>
    %cst_6 = arith.constant 1.000000e+00 : f32
    %20 = vector.broadcast %cst_6 : f32 to vector<8x1xf32>
    %21 = arith.subf %20, %19 : vector<8x1xf32>
    %cst_7 = arith.constant -5.000000e-01 : f32
    %22 = vector.broadcast %cst_7 : f32 to vector<8x1xf32>
    %23 = arith.divf %22, %21 : vector<8x1xf32>
    %24 = arith.mulf %23, %16 : vector<8x1xf32>
    %25 = arith.mulf %24, %16 : vector<8x1xf32>
    %cst_8 = arith.constant -2.000000e+00 : f32
    %26 = vector.broadcast %cst_8 : f32 to vector<8x1xf32>
    %27 = arith.mulf %26, %14 : vector<8x1xf32>
    %28 = arith.mulf %27, %23 : vector<8x1xf32>
    %29 = arith.mulf %28, %16 : vector<8x1xf32>
    %30 = arith.mulf %29, %18 : vector<8x1xf32>
    %31 = arith.mulf %23, %18 : vector<8x1xf32>
    %32 = arith.mulf %31, %18 : vector<8x1xf32>
    %33 = arith.mulf %1, %16 : vector<8x1xf32>
    %34 = arith.mulf %33, %18 : vector<8x1xf32>
    %35 = math.sqrt %21 : vector<8x1xf32>
    %cst_9 = arith.constant 6.28318548 : f32
    %36 = vector.broadcast %cst_9 : f32 to vector<8x1xf32>
    %37 = arith.mulf %36, %35 : vector<8x1xf32>
    %38 = arith.divf %34, %37 : vector<8x1xf32>
    %c0_10 = arith.constant 0 : index
    %c0_11 = arith.constant 0 : index
    %39 = vector.load %arg1[%c0_10, %c0_11] : memref<2x400xf32, #tpu.memory_space<vmem>>, vector<1x400xf32>
    %c1 = arith.constant 1 : index
    %c0_12 = arith.constant 0 : index
    %40 = vector.load %arg1[%c1, %c0_12] : memref<2x400xf32, #tpu.memory_space<vmem>>, vector<1x400xf32>
    %41 = vector.broadcast %39 : vector<1x400xf32> to vector<8x400xf32>
    %42 = vector.broadcast %2 : vector<8x1xf32> to vector<8x400xf32>
    %43 = arith.subf %41, %42 : vector<8x400xf32>
    %44 = vector.broadcast %40 : vector<1x400xf32> to vector<8x400xf32>
    %45 = vector.broadcast %3 : vector<8x1xf32> to vector<8x400xf32>
    %46 = arith.subf %44, %45 : vector<8x400xf32>
    %47 = vector.broadcast %25 : vector<8x1xf32> to vector<8x400xf32>
    %48 = arith.mulf %47, %43 : vector<8x400xf32>
    %49 = vector.broadcast %30 : vector<8x1xf32> to vector<8x400xf32>
    %50 = arith.mulf %49, %46 : vector<8x400xf32>
    %51 = arith.addf %48, %50 : vector<8x400xf32>
    %52 = arith.mulf %43, %51 : vector<8x400xf32>
    %53 = vector.broadcast %32 : vector<8x1xf32> to vector<8x400xf32>
    %54 = arith.mulf %53, %46 : vector<8x400xf32>
    %55 = arith.mulf %54, %46 : vector<8x400xf32>
    %56 = arith.addf %52, %55 : vector<8x400xf32>
    %57 = math.exp %56 : vector<8x400xf32>
    %58 = vector.broadcast %38 : vector<8x1xf32> to vector<8x400xf32>
    %59 = arith.mulf %58, %57 : vector<8x400xf32>
    %c0_13 = arith.constant 0 : index
    %c0_14 = arith.constant 0 : index
    %60 = vector.load %arg3[%c0_13, %c0_14] : memref<8x400xf32, #tpu.memory_space<vmem>>, vector<8x400xf32>
    tpu.vector_store %arg3[%c0_13, %c0_14], %59 {strides = array<i32>} : memref<8x400xf32, #tpu.memory_space<vmem>>, vector<8x400xf32>,
    return
  }
  func.func @transform_0(%arg0: i32) -> (i32, i32) {
    %c0_i32 = arith.constant 0 : i32
    %c0_i32_0 = arith.constant 0 : i32
    %c0_i32_1 = arith.constant 0 : i32
    return %c0_i32, %c0_i32_0 : i32, i32
  }
  func.func @transform_1(%arg0: i32) -> (i32, i32) {
    %c0_i32 = arith.constant 0 : i32
    %c0_i32_0 = arith.constant 0 : i32
    return %arg0, %c0_i32 : i32, i32
  }
  func.func @transform_2(%arg0: i32) -> (i32, i32) {
    %c0_i32 = arith.constant 0 : i32
    %c0_i32_0 = arith.constant 0 : i32
    return %arg0, %c0_i32 : i32, i32
  }
}

</mosaic_0001>

<bundles_post_ra>
// kernel: tpu_custom_call.1
= control target key start
LH: loop header
LB: loop body
LE: loop exit
PB: predicated region body
PF: predicated region fallthrough
CT: control target
= control target key end

     0   :  { %7 = vsyncpa [#allocation3], 0  ;;  %s396_s0 = inlined_call_operand.hbm [shape: f32[2,400], index: 0, kind: input, shape index: {}]   ;;  %s397_s1 = inlined_call_operand.hbm [shape: f32[8,6], index: 1, kind: input, shape index: {}]   ;;  %s398_s2 = inlined_call_operand.hbm [shape: f32[8,400], index: 2, kind: output, shape index: {}]  }
   0x1   :  { %8 = vsyncpa [#allocation6], 0 }
   0x2   :  { %9 = vsyncpa [#allocation4], 0  ;;  %s333_s9 = smov [#allocation2]   ;;  %s334_s11 = smov [#allocation5]  }
   0x3   :  { %s16_s10 = sshll.u32 %s333_s9, 4  ;;  %s26_s12 = sshll.u32 %s334_s11, 4  ;;  %s17_s10 = int_to_ptr.vmem [resolvable:$true] %s16_s10  ;;  %s27_s12 = int_to_ptr.vmem [resolvable:$true] %s26_s12 }
   0x4   :  { %s261_s15 = scalar_lea.hbm %s396_s0, 128 }
   0x5   :  { %p262_p0 = scmp.ne.s32.totalorder %s396_s0, %s261_s15  ;;  %p265_p1 = scmp.lt.u32.totalorder %s261_s15, %s396_s0 }
   0x7   :  { %p267_p2 = pnand %p265_p1, %p262_p0 }
   0x9   :  { %270 = shalt.err (!%p267_p2)
}
   0xa   :  { %s271_s20 = scalar_lea.vmem %s17_s10, 128  ;;  %p276_p4 = scmp.lt.s32.totalorder %s17_s10, %s17_s10 }
   0xb   :  { %p272_p3 = scmp.ne.s32.totalorder %s17_s10, %s271_s20  ;;  %p277_p5 = scmp.lt.s32.totalorder %s271_s20, %s271_s20 }
   0xd   :  { %p278_p6 = por %p277_p5, %p276_p4 }
   0xf   :  { %p279_p7 = pnand %p278_p6, %p272_p3 }
  0x11   :  { %282 = shalt.err (!%p279_p7)
}
  0x12   :  { %19 = dma.hbm_to_vmem [thread:$0]  %s396_s0, 128, %s17_s10, [#allocation3]  }
  0x13   :  { %s283_s25 = scalar_lea.hbm %s397_s1, 128 }
  0x14   :  { %p284_p8 = scmp.ne.s32.totalorder %s397_s1, %s283_s25  ;;  %p287_p9 = scmp.lt.u32.totalorder %s283_s25, %s397_s1 }
  0x16   :  { %p289_p10 = pnand %p287_p9, %p284_p8 }
  0x18   :  { %292 = shalt.err (!%p289_p10)
}
  0x19   :  { %s293_s30 = scalar_lea.vmem %s27_s12, 128  ;;  %p298_p12 = scmp.lt.s32.totalorder %s27_s12, %s27_s12 }
  0x1a   :  { %p294_p11 = scmp.ne.s32.totalorder %s27_s12, %s293_s30  ;;  %p299_p13 = scmp.lt.s32.totalorder %s293_s30, %s293_s30 }
  0x1c   :  { %p300_p0 = por %p299_p13, %p298_p12 }
  0x1e   :  { %p301_p1 = pnand %p300_p0, %p294_p11 }
  0x20   :  { %304 = shalt.err (!%p301_p1)
}
  0x21   :  { %29 = dma.hbm_to_vmem [thread:$0]  %s397_s1, 128, %s27_s12, [#allocation6]  }
  0x22   :  { %327 = dma.done.wait [#allocation3], 128  }
  0x23   :  { %328 = vsyncadd [#allocation3], 4294967168 }
  0x24   :  { %329 = dma.done.wait [#allocation6], 128  }
  0x25   :  { %330 = vsyncadd [#allocation6], 4294967168  ;;  %v335_v0 = vmov 1   ;;  %v36_v1 = vld [vmem:[#allocation5] sm:$0xff]  ;;  %v336_v5 = vmov 2   ;;  %s337_s4 = smov 2   ;;  %v87_v35 = vlaneseq }
  0x26   :  { %239 = vset.pattern.permute.xlu1 %v335_v0  ;;  %v37_v2 = vmax.f32 %v36_v1, 0.0001  ;;  %v226_v3 = vclamps-f32 %v36_v1, 0.99  ;;  %240 = vset.pattern.permute.xlu0 %v336_v5  ;;  %s338_s1 = smov 1   ;;  %s339_s5 = smov 124  }
  0x27   :  { %s340_s6 = smov 123   ;;  %s341_s7 = smov 125   ;;  %v342_v18 = vmov 5   ;;  %v343_v28 = vmov 0   ;;  %v88_v36 = vshrl.u32 %v87_v35, 7  ;;  %vm208_vm2 = vcmask 130048  }
  0x28   :  { %245 = vrcp.f32 %v37_v2  ;;  %v42_v4 = vmul.f32 %v226_v3, %v226_v3  ;;  %v52_v10 = vmul.f32 -2.0, %v226_v3  ;;  %v85_v42 = vld [vmem:[#allocation2 + $0x1] ss:$2 sm:$0xf]  ;;  %s344_s8 = smov [#allocation7]  }
  0x29   :  { %v89_v37 = vsub.s32 0, %v88_v36  ;;  %v93_v38 = vsub.s32 1, %v88_v36  ;;  %v97_v39 = vsub.s32 2, %v88_v36  ;;  %v101_v40 = vsub.s32 3, %v88_v36  ;;  %s216_s9 = sshll.u32 %s344_s8, 4  ;;  %s217_s9 = int_to_ptr.vmem [resolvable:$true] %s216_s9 }
  0x2a   :  { %v43_v6 = vsub.f32 1.0, %v42_v4  ;;  %v83_v43 = vld [vmem:[#allocation2] ss:$2 sm:$0xf]  ;;  %s305_s10 = scalar_lea.vmem %s217_s9, 512  ;;  %p310_p3 = scmp.lt.s32.totalorder %s217_s9, %s217_s9 }
  0x2b   :  { %v120_v44 = vrot.slane %v85_v42, %v89_v37  ;;  %v124_v45 = vrot.slane %v85_v42, %v93_v38  ;;  %v128_v46 = vrot.slane %v85_v42, %v97_v39  ;;  %v132_v47 = vrot.slane %v85_v42, %v101_v40  ;;  %p306_p2 = scmp.ne.s32.totalorder %s217_s9, %s305_s10  ;;  %p311_p4 = scmp.lt.s32.totalorder %s305_s10, %s305_s10 }
  0x2c   :  { %247 = vrsqrt.f32 %v43_v6  ;;  %vm71_vm0 = vcmp.eq.f32.partialorder %v43_v6, inf  ;;  %v74_v9 = vand.u32 2147483648, %v43_v6  ;;  %vm73_vm1 = vcmp.eq.f32.partialorder %v43_v6, 0.0 }
  0x2d   :  { %249 = vrcp.f32 %v43_v6  ;;  %v90_v48 = vrot.slane %v83_v43, %v89_v37  ;;  %v94_v49 = vrot.slane %v83_v43, %v93_v38  ;;  %v98_v50 = vrot.slane %v83_v43, %v97_v39  ;;  %p312_p5 = por %p311_p4, %p310_p3 }
  0x2e   :  { %v102_v51 = vrot.slane %v83_v43, %v101_v40 }
  0x2f   :  { %p313_p6 = pnand %p312_p5, %p306_p2 }
  0x32   :  { %v246_v7 = vpop.eup %245 }
  0x33   :  { %47 = vrot.lane.b32.xlu0 %v246_v7, %s337_s4 }
  0x36   :  { %v248_v8 = vpop.eup %247 }
  0x37   :  { %v250_v11 = vpop.eup %249  ;;  %55 = vrot.lane.b32.xlu0 %v246_v7, %s338_s1  ;;  %v70_v12 = vmul.f32 %v248_v8, %v43_v6 }
  0x38   :  { %v45_v13 = vmul.f32 -0.5, %v250_v11 }
  0x39   :  { %v72_v14 = vsel %vm71_vm0, %v43_v6, %v70_v12 }
  0x3a   :  { %v75_v15 = vsel %vm73_vm1, %v74_v9, %v72_v14  ;;  %v53_v16 = vmul.f32 %v52_v10, %v45_v13 }
  0x3b   :  { %v76_v17 = vmul.f32 6.2831855, %v75_v15  ;;  %65 = vrot.lane.b32.xlu0 %v246_v7, %s339_s5 }
  0x3d   :  { %78 = vrot.lane.b32.xlu1 %v76_v17, %s340_s6 }
  0x3f   :  { %138 = vperm.xlu0 %240, %v36_v1  }
  0x41   :  { %61 = vrot.lane.b32.xlu1 %v246_v7, %s341_s7 }
  0x43   :  { %242 = vset.pattern.permute.xlu0 %v342_v18 }
  0x45   :  { %109 = vperm.xlu1 %239, %v36_v1  }
  0x49   :  { %241 = vset.pattern.permute.xlu1 %v342_v18 }
  0xa5   :  { %v48_v19 = vpop.permute.xlu0 %47 }
  0xa6   :  { %v50_v20 = vmul.f32 %v48_v19, %v45_v13  ;;  %v54_v23 = vmul.f32 %v53_v16, %v48_v19 }
  0xa8   :  { %v51_v21 = vmul.f32 %v50_v20, %v48_v19 }
  0xa9   :  { %v56_v22 = vpop.permute.xlu0 %55 }
  0xaa   :  { %v59_v24 = vmul.f32 %v56_v22, %v45_v13  ;;  %147 = vperm.xlu1 %241, %v51_v21   ;;  %v58_v25 = vmul.f32 %v56_v22, %v54_v23 }
  0xac   :  { %v60_v26 = vmul.f32 %v59_v24, %v56_v22 }
  0xad   :  { %v66_v31 = vpop.permute.xlu0 %65 }
  0xae   :  { %173 = vperm.xlu0 %242, %v60_v26   ;;  %156 = vperm.xlu1 %241, %v58_v25  }
  0xaf   :  { %v79_v27 = vpop.permute.xlu1 %78 }
  0xb0   :  { %251 = vrcp.f32 %v79_v27 }
  0xb2   :  { %243 = vset.pattern.permute.xlu1 %v343_v28  ;;  %244 = vset.pattern.permute.xlu0 %v343_v28 }
  0xb3   :  { %v62_v29 = vpop.permute.xlu1 %61 }
  0xb4   :  { %v64_v30 = vmul.f32 %v62_v29, %v36_v1 }
  0xb6   :  { %v68_v32 = vmul.f32 %v66_v31, %v64_v30 }
  0xba   :  { %v252_v33 = vpop.eup %251 }
  0xbb   :  { %v82_v34 = vmul.f32 %v252_v33, %v68_v32 }
  0xbd   :  { %198 = vperm.xlu1 %243, %v82_v34  }
  0xbe   :  { %v139_v52 = vpop.permute.xlu0 %138 }
  0xbf   :  { %v141_v54 = vsub.f32 %v120_v44, %v139_v52  ;;  %v142_v55 = vsub.f32 %v124_v45, %v139_v52  ;;  %v143_v56 = vsub.f32 %v128_v46, %v139_v52  ;;  %v144_v57 = vsub.f32 %v132_v47, %v139_v52 }
  0xc4   :  { %v110_v41 = vpop.permute.xlu1 %109 }
  0xc5   :  { %v112_v58 = vsub.f32 %v90_v48, %v110_v41  ;;  %v113_v59 = vsub.f32 %v94_v49, %v110_v41  ;;  %v114_v60 = vsub.f32 %v98_v50, %v110_v41  ;;  %v115_v61 = vsub.f32 %v102_v51, %v110_v41 }
 0x129   :  { %v148_v53 = vpop.permute.xlu1 %147 }
 0x12a   :  { %v150_v62 = vmul.f32 %v148_v53, %v112_v58  ;;  %v151_v63 = vmul.f32 %v148_v53, %v113_v59  ;;  %v152_v0 = vmul.f32 %v148_v53, %v114_v60  ;;  %v153_v1 = vmul.f32 %v148_v53, %v115_v61 }
 0x12d   :  { %v157_v2 = vpop.permute.xlu1 %156  ;;  %v174_v3 = vpop.permute.xlu0 %173 }
 0x12e   :  { %v159_v4 = vmul.f32 %v157_v2, %v141_v54  ;;  %v160_v5 = vmul.f32 %v157_v2, %v142_v55  ;;  %v161_v6 = vmul.f32 %v157_v2, %v143_v56  ;;  %v162_v7 = vmul.f32 %v157_v2, %v144_v57 }
 0x12f   :  { %v176_v8 = vmul.f32 %v174_v3, %v141_v54  ;;  %v177_v9 = vmul.f32 %v174_v3, %v142_v55  ;;  %v178_v10 = vmul.f32 %v174_v3, %v143_v56  ;;  %v179_v11 = vmul.f32 %v174_v3, %v144_v57 }
 0x130   :  { %v163_v12 = vadd.f32 %v159_v4, %v150_v62  ;;  %v164_v13 = vadd.f32 %v160_v5, %v151_v63  ;;  %v165_v14 = vadd.f32 %v161_v6, %v152_v0  ;;  %v166_v15 = vadd.f32 %v162_v7, %v153_v1 }
 0x131   :  { %v180_v16 = vmul.f32 %v176_v8, %v141_v54  ;;  %v181_v17 = vmul.f32 %v177_v9, %v142_v55  ;;  %v182_v18 = vmul.f32 %v178_v10, %v143_v56  ;;  %v183_v19 = vmul.f32 %v179_v11, %v144_v57 }
 0x132   :  { %v167_v20 = vmul.f32 %v163_v12, %v112_v58  ;;  %v168_v21 = vmul.f32 %v164_v13, %v113_v59  ;;  %v169_v22 = vmul.f32 %v165_v14, %v114_v60  ;;  %v170_v23 = vmul.f32 %v166_v15, %v115_v61 }
 0x134   :  { %v184_v24 = vadd.f32 %v180_v16, %v167_v20  ;;  %v185_v25 = vadd.f32 %v181_v17, %v168_v21  ;;  %v186_v26 = vadd.f32 %v182_v18, %v169_v22  ;;  %v187_v27 = vadd.f32 %v183_v19, %v170_v23 }
 0x136   :  { %v188_v28 = vmul.f32 1.442695, %v184_v24  ;;  %v190_v29 = vmul.f32 1.442695, %v185_v25  ;;  %v192_v30 = vmul.f32 1.442695, %v186_v26 }
 0x137   :  { %v194_v31 = vmul.f32 1.442695, %v187_v27 }
 0x138   :  { %253 = vpow2.f32 %v188_v28 }
 0x139   :  { %255 = vpow2.f32 %v190_v29 }
 0x13a   :  { %257 = vpow2.f32 %v192_v30 }
 0x13b   :  { %259 = vpow2.f32 %v194_v31 }
 0x13c   :  { %v199_v32 = vpop.permute.xlu1 %198 }
 0x142   :  { %v254_v33 = vpop.eup %253 }
 0x143   :  { %v256_v34 = vpop.eup %255  ;;  %v201_v35 = vmul.f32 %v254_v33, %v199_v32 }
 0x144   :  { %v258_v36 = vpop.eup %257  ;;  %v202_v37 = vmul.f32 %v256_v34, %v199_v32 }
 0x145   :  { %v260_v38 = vpop.eup %259  ;;  %v203_v39 = vmul.f32 %v258_v36, %v199_v32  ;;  %205 = vst [vmem:[#allocation7] sm:$0xff] %v201_v35 }
 0x146   :  { %v204_v40 = vmul.f32 %v260_v38, %v199_v32  ;;  %206 = vst [vmem:[#allocation7 + $0x8] sm:$0xff] %v202_v37 }
 0x147   :  { %207 = vst [vmem:[#allocation7 + $0x10] sm:$0xff] %v203_v39 }
 0x148   :  { %209 = vst.msk [vmem:[#allocation7 + $0x18] sm:$0xff] %vm208_vm2, %v204_v40 }
 0x149   :  { %316 = shalt.err (!%p313_p6)
}
 0x14a   :  { %s317_s13 = scalar_lea.hbm %s398_s2, 512 }
 0x14b   :  { %p318_p7 = scmp.ne.s32.totalorder %s398_s2, %s317_s13  ;;  %p321_p8 = scmp.lt.u32.totalorder %s317_s13, %s398_s2 }
 0x14d   :  { %p323_p9 = pnand %p321_p8, %p318_p7 }
 0x14f   :  { %326 = shalt.err (!%p323_p9)
}
 0x150   :  { %219 = dma.vmem_to_hbm [thread:$0]  %s217_s9, 512, %s398_s2, [#allocation4]  }
 0x151   :  { %331 = dma.done.wait [#allocation4], 512  }
 0x152   :  { %332 = vsyncadd [#allocation4], 4294966784 }
 0x153   :  { %223 = vsyncpa [#allocation3], 1 }
 0x154   :  { %224 = vsyncpa [#allocation6], 1 }
 0x155   :  { %225 = vsyncpa [#allocation4], 1 }

</bundles_post_ra>
